<compile_context>
chip_gen: v7x
topology: tpu7x:2x2x1
jax: 0.10.0
libtpu: 0.0.40
codegen_flags: <defaults>
</compile_context>

<pallas_src>
import functools

import jax
import jax.numpy as jnp
from jax.experimental import pallas as pl
from jax.experimental.pallas import tpu as pltpu

_INV_SQRT2 = 0.7071067811865476


def _adapter_kernel(x_ref, w1_ref, b1_ref, w2_ref, b2_ref, o_ref, *, compute_dtype):
    x = x_ref[...]                                                     # [TM, H], io dtype
    # down-projection (MXU, f32 accumulation)
    h = jnp.dot(x.astype(compute_dtype), w1_ref[...],
                preferred_element_type=jnp.float32) + b1_ref[...]
    # exact GELU (erf form == PyTorch nn.GELU default), f32
    h = 0.5 * h * (1.0 + jax.lax.erf(h * _INV_SQRT2))
    # up-projection (MXU, f32 accumulation)
    y = jnp.dot(h.astype(compute_dtype), w2_ref[...],
                preferred_element_type=jnp.float32) + b2_ref[...]
    # residual in f32 (portable across v5e/v6e/v7x), cast once on store
    o_ref[...] = (x.astype(jnp.float32) + y).astype(o_ref.dtype)


def _round_up(n, m):
    return ((n + m - 1) // m) * m


def _pick_tile_tokens(tokens):
    """Token-tile rows: aim for >=~8 grid steps so the x/out DMAs overlap compute
    (and the grid splits across v7x's 2 TensorCores); floor 256, ceiling 512 rows
    (512 already ~85% of HBM roofline), never exceeding the 8-rounded token count."""
    tm = _round_up(pl.cdiv(tokens, 8), 8)     # target ~8 grid steps
    tm = max(tm, 256)                          # floor
    tm = min(tm, 512)                          # ceiling
    tm = min(tm, _round_up(tokens, 8))         # tiny inputs: single (ragged) tile
    return max(tm, 8)


def bert_adapter(x, w1, b1, w2, b2, *, compute_dtype=jnp.bfloat16, tile_tokens=None):
    """x: [..., hidden]. Returns x + Linear2(GELU(Linear1(x))) in x.dtype.

    w1: (hidden, adapter), b1: (adapter,)  |  w2: (adapter, hidden), b2: (hidden,)
    Pass bf16 `x` to stream activations in bf16 (halves HBM traffic).
    `tile_tokens`, if given, must be a multiple of 8.
    """
    orig_shape = x.shape
    hidden = orig_shape[-1]
    adapter = w1.shape[1]

    x2d = x.reshape(-1, hidden)
    tokens = x2d.shape[0]
    io_bytes = jnp.dtype(x2d.dtype).itemsize

    # Lane-dense intermediate: pad adapter dim to a multiple of 128 (weights only --
    # tiny one-time cost). Exact because GELU(0)=0 and the padded rows of w2 are zero.
    adapter_p = _round_up(max(adapter, 128), 128)
    b1 = jnp.asarray(b1).reshape(1, adapter)
    b2 = jnp.asarray(b2).reshape(1, hidden)
    if adapter_p != adapter:
        w1 = jnp.pad(w1, ((0, 0), (0, adapter_p - adapter)))
        b1 = jnp.pad(b1, ((0, 0), (0, adapter_p - adapter)))
        w2 = jnp.pad(w2, ((0, adapter_p - adapter), (0, 0)))
    w1 = w1.astype(compute_dtype)              # resident weights in compute dtype
    w2 = w2.astype(compute_dtype)
    b1 = b1.astype(jnp.float32)                # biases added in f32
    b2 = b2.astype(jnp.float32)
    cw_bytes = jnp.dtype(compute_dtype).itemsize

    tm = int(tile_tokens) if tile_tokens is not None else _pick_tile_tokens(tokens)
    grid = (pl.cdiv(tokens, tm),)              # ragged last block handled by Pallas

    # Scoped-VMEM limit: actual buffer sum + headroom (no chip-version guessing).
    buf_bytes = (
        2 * 2 * tm * hidden * io_bytes                  # x + out tiles, double-buffered
        + 2 * 2 * hidden * adapter_p * cw_bytes         # w1 + w2 (double-buffered)
        + 2 * (adapter_p + hidden) * 4                  # biases (f32)
        + tm * adapter_p * 4 + 2 * tm * hidden * 4      # f32 intermediates / epilogue
    )
    vmem_limit = int(min(64 << 20, max(32 << 20, buf_bytes + (8 << 20))))

    out = pl.pallas_call(
        functools.partial(_adapter_kernel, compute_dtype=compute_dtype),
        out_shape=jax.ShapeDtypeStruct((tokens, hidden), x.dtype),
        grid_spec=pltpu.PrefetchScalarGridSpec(
            num_scalar_prefetch=0,
            grid=grid,
            in_specs=[
                pl.BlockSpec((tm, hidden), lambda i: (i, 0)),          # x: streamed
                pl.BlockSpec((hidden, adapter_p), lambda i: (0, 0)),    # w1: resident
                pl.BlockSpec((1, adapter_p), lambda i: (0, 0)),         # b1: resident
                pl.BlockSpec((adapter_p, hidden), lambda i: (0, 0)),    # w2: resident
                pl.BlockSpec((1, hidden), lambda i: (0, 0)),            # b2: resident
            ],
            out_specs=pl.BlockSpec((tm, hidden), lambda i: (i, 0)),
        ),
        compiler_params=pltpu.CompilerParams(
            dimension_semantics=("parallel",),   # independent token tiles (v7x megacore)
            vmem_limit_bytes=vmem_limit,
        ),
    )(x2d, w1, b1, w2, b2)

    return out.reshape(orig_shape)


def _xavier_uniform(key, fan_in, fan_out, dtype=jnp.float32):
    # matches torch.nn.init.xavier_uniform_: U(-a, a), a = sqrt(6 / (fan_in + fan_out))
    bound = (6.0 / (fan_in + fan_out)) ** 0.5
    return jax.random.uniform(key, (fan_in, fan_out), dtype, minval=-bound, maxval=bound)


def init_params(key, hidden_size, adapter_size):
    k1, k2 = jax.random.split(key)
    w1 = _xavier_uniform(k1, hidden_size, adapter_size)    # Linear(hidden -> adapter)
    b1 = jnp.zeros((adapter_size,), jnp.float32)
    w2 = _xavier_uniform(k2, adapter_size, hidden_size)    # Linear(adapter -> hidden)
    b2 = jnp.zeros((hidden_size,), jnp.float32)
    return w1, b1, w2, b2


if __name__ == "__main__":
    key = jax.random.PRNGKey(0)
    hidden, adapter = 32, 16

    kx, kx2, kp = jax.random.split(key, 3)
    x = jax.random.normal(kx, (2, 8, hidden), jnp.float32)
    w1, b1, w2, b2 = init_params(kp, hidden, adapter)

    def ref_fn(xx):
        x2d = xx.reshape(-1, hidden)
        h = x2d @ w1 + b1.reshape(1, -1)
        h = 0.5 * h * (1.0 + jax.lax.erf(h * _INV_SQRT2))
        return (x2d + (h @ w2 + b2.reshape(1, -1))).reshape(xx.shape)

    y_ref = ref_fn(x)

    # exact-parity path (f32 matmuls, f32 I/O) — tight tolerance
    out_f32 = bert_adapter(x, w1, b1, w2, b2, compute_dtype=jnp.float32)
    jax.block_until_ready(out_f32)
    assert jnp.allclose(out_f32, y_ref, atol=1e-5, rtol=1e-5), "f32 path mismatch"

    # default fast path (bf16 MXU matmuls, f32 accumulation, f32 I/O)
    out = bert_adapter(x, w1, b1, w2, b2)
    jax.block_until_ready(out)
    assert jnp.allclose(out, y_ref, atol=5e-2, rtol=5e-2), "bf16-compute path mismatch"

    # bf16-streamed path (halves HBM traffic; recommended when activations are bf16)
    out_bf = bert_adapter(x.astype(jnp.bfloat16), w1, b1, w2, b2)
    jax.block_until_ready(out_bf)
    assert out_bf.dtype == jnp.bfloat16
    assert jnp.allclose(out_bf.astype(jnp.float32), y_ref, atol=1e-1, rtol=1e-1), \
        "bf16 I/O path mismatch"

    # ragged last block: tokens (40) not divisible by the tile (16) — no host pad/slice
    x2 = jax.random.normal(kx2, (5, 8, hidden), jnp.float32)
    y2_ref = ref_fn(x2)
    out2 = bert_adapter(x2, w1, b1, w2, b2, compute_dtype=jnp.float32, tile_tokens=16)
    jax.block_until_ready(out2)
    assert jnp.allclose(out2, y2_ref, atol=1e-5, rtol=1e-5), "ragged-tile path mismatch"

    print("KERNEL_OK")
</pallas_src>

<mosaic_0001>
module attributes {stable_mosaic.version = 11 : i64} {
  func.func @_adapter_kernel(%arg0: i32, %arg1: memref<16x32xf32, #tpu.memory_space<vmem>>, %arg2: memref<32x128xf32, #tpu.memory_space<vmem>>, %arg3: memref<1x128xf32, #tpu.memory_space<vmem>>, %arg4: memref<128x32xf32, #tpu.memory_space<vmem>>, %arg5: memref<1x32xf32, #tpu.memory_space<vmem>>, %arg6: memref<16x32xf32, #tpu.memory_space<vmem>>) attributes {dimension_semantics = [#tpu.dimension_semantics<parallel>], iteration_bounds = array<i64: 1>, scalar_prefetch = 0 : i64, scratch_operands = 0 : i64, tpu.core_type = #tpu.core_type<tc>, window_params = [{transform_indices = @transform_0, window_bounds = array<i64: 16, 32>}, {pipeline_mode = #tpu.pipeline_mode<synchronous>, transform_indices = @transform_1, window_bounds = array<i64: 32, 128>}, {pipeline_mode = #tpu.pipeline_mode<synchronous>, transform_indices = @transform_2, window_bounds = array<i64: 1, 128>}, {pipeline_mode = #tpu.pipeline_mode<synchronous>, transform_indices = @transform_3, window_bounds = array<i64: 128, 32>}, {pipeline_mode = #tpu.pipeline_mode<synchronous>, transform_indices = @transform_4, window_bounds = array<i64: 1, 32>}, {transform_indices = @transform_5, window_bounds = array<i64: 16, 32>}]} {
    %c0 = arith.constant 0 : index
    %c0_0 = arith.constant 0 : index
    %0 = vector.load %arg1[%c0, %c0_0] : memref<16x32xf32, #tpu.memory_space<vmem>>, vector<16x32xf32>
    %c0_1 = arith.constant 0 : index
    %c0_2 = arith.constant 0 : index
    %1 = vector.load %arg2[%c0_1, %c0_2] : memref<32x128xf32, #tpu.memory_space<vmem>>, vector<32x128xf32>
    %cst = arith.constant dense<0.000000e+00> : vector<16x128xf32>
    %2 = tpu.matmul %0, %1, %cst {dimension_numbers = #tpu.dot_dimension_numbers<[1], [0], [0], [1], [0, 0, 1, 1], [], []>} : vector<16x32xf32>, vector<32x128xf32>, vector<16x128xf32> -> vector<16x128xf32>
    %c0_3 = arith.constant 0 : index
    %c0_4 = arith.constant 0 : index
    %3 = vector.load %arg3[%c0_3, %c0_4] : memref<1x128xf32, #tpu.memory_space<vmem>>, vector<1x128xf32>
    %4 = vector.broadcast %3 : vector<1x128xf32> to vector<16x128xf32>
    %5 = arith.addf %2, %4 : vector<16x128xf32>
    %cst_5 = arith.constant 5.000000e-01 : f32
    %6 = vector.broadcast %cst_5 : f32 to vector<16x128xf32>
    %7 = arith.mulf %6, %5 : vector<16x128xf32>
    %cst_6 = arith.constant 0.707106769 : f32
    %8 = vector.broadcast %cst_6 : f32 to vector<16x128xf32>
    %9 = arith.mulf %5, %8 : vector<16x128xf32>
    %10 = math.erf %9 : vector<16x128xf32>
    %cst_7 = arith.constant 1.000000e+00 : f32
    %11 = vector.broadcast %cst_7 : f32 to vector<16x128xf32>
    %12 = arith.addf %11, %10 : vector<16x128xf32>
    %13 = arith.mulf %7, %12 : vector<16x128xf32>
    %c0_8 = arith.constant 0 : index
    %c0_9 = arith.constant 0 : index
    %14 = vector.load %arg4[%c0_8, %c0_9] : memref<128x32xf32, #tpu.memory_space<vmem>>, vector<128x32xf32>
    %cst_10 = arith.constant dense<0.000000e+00> : vector<16x32xf32>
    %15 = tpu.matmul %13, %14, %cst_10 {dimension_numbers = #tpu.dot_dimension_numbers<[1], [0], [0], [1], [0, 0, 1, 1], [], []>} : vector<16x128xf32>, vector<128x32xf32>, vector<16x32xf32> -> vector<16x32xf32>
    %c0_11 = arith.constant 0 : index
    %c0_12 = arith.constant 0 : index
    %16 = vector.load %arg5[%c0_11, %c0_12] : memref<1x32xf32, #tpu.memory_space<vmem>>, vector<1x32xf32>
    %17 = vector.broadcast %16 : vector<1x32xf32> to vector<16x32xf32>
    %18 = arith.addf %15, %17 : vector<16x32xf32>
    %19 = arith.addf %0, %18 : vector<16x32xf32>
    %c0_13 = arith.constant 0 : index
    %c0_14 = arith.constant 0 : index
    %20 = vector.load %arg6[%c0_13, %c0_14] : memref<16x32xf32, #tpu.memory_space<vmem>>, vector<16x32xf32>
    tpu.vector_store %arg6[%c0_13, %c0_14], %19 {strides = array<i32>} : memref<16x32xf32, #tpu.memory_space<vmem>>, vector<16x32xf32>,
    return
  }
  func.func @transform_0(%arg0: i32) -> (i32, i32) {
    %c0_i32 = arith.constant 0 : i32
    %c0_i32_0 = arith.constant 0 : i32
    return %arg0, %c0_i32 : i32, i32
  }
  func.func @transform_1(%arg0: i32) -> (i32, i32) {
    %c0_i32 = arith.constant 0 : i32
    %c0_i32_0 = arith.constant 0 : i32
    %c0_i32_1 = arith.constant 0 : i32
    return %c0_i32, %c0_i32_0 : i32, i32
  }
  func.func @transform_2(%arg0: i32) -> (i32, i32) {
    %c0_i32 = arith.constant 0 : i32
    %c0_i32_0 = arith.constant 0 : i32
    %c0_i32_1 = arith.constant 0 : i32
    return %c0_i32, %c0_i32_0 : i32, i32
  }
  func.func @transform_3(%arg0: i32) -> (i32, i32) {
    %c0_i32 = arith.constant 0 : i32
    %c0_i32_0 = arith.constant 0 : i32
    %c0_i32_1 = arith.constant 0 : i32
    return %c0_i32, %c0_i32_0 : i32, i32
  }
  func.func @transform_4(%arg0: i32) -> (i32, i32) {
    %c0_i32 = arith.constant 0 : i32
    %c0_i32_0 = arith.constant 0 : i32
    %c0_i32_1 = arith.constant 0 : i32
    return %c0_i32, %c0_i32_0 : i32, i32
  }
  func.func @transform_5(%arg0: i32) -> (i32, i32) {
    %c0_i32 = arith.constant 0 : i32
    %c0_i32_0 = arith.constant 0 : i32
    return %arg0, %c0_i32 : i32, i32
  }
}

</mosaic_0001>

<bundles_post_ra>
// kernel: tpu_custom_call.1
= control target key start
LH: loop header
LB: loop body
LE: loop exit
PB: predicated region body
PF: predicated region fallthrough
CT: control target
= control target key end

     0   :  { %vm34_vm0 = vcmask 261120   ;;  %s514_s0 = inlined_call_operand.vmem [shape: f32[16,32], index: 0, kind: input, shape index: {}]   ;;  %s515_s1 = inlined_call_operand.vmem [shape: f32[32,128], index: 1, kind: input, shape index: {}]   ;;  %s516_s2 = inlined_call_operand.vmem [shape: f32[1,128], index: 2, kind: input, shape index: {}]   ;;  %s517_s3 = inlined_call_operand.vmem [shape: f32[128,32], index: 3, kind: input, shape index: {}]   ;;  %s518_s4 = inlined_call_operand.vmem [shape: f32[1,32], index: 4, kind: input, shape index: {}]   ;;  %s519_s5 = inlined_call_operand.hbm [shape: f32[16,32], index: 5, kind: output, shape index: {}]  }
   0x1   :  { %v23_v0 = vld [vmem:[%s515_s1] sm:$0xff]  ;;  %v24_v1 = vld [vmem:[%s515_s1 + $0x8] sm:$0xff]  ;;  %v25_v2 = vld [vmem:[%s515_s1 + $0x10] sm:$0xff] }
   0x2   :  { %v318_v3 = vpack.c.bf16 %v24_v1, %v23_v0  ;;  %v26_v4 = vld [vmem:[%s515_s1 + $0x18] sm:$0xff]  ;;  %v437_v5 = vld [vmem:[%s514_s0] sm:$0xff]  ;;  %v127_v8 = vld [vmem:[%s517_s3 + $0x8] sm:$0xff] }
   0x3   :  { %v322_v6 = vpack.c.bf16 %v26_v4, %v25_v2  ;;  %280 = vmatprep.mubr.msk.f32.mxu0 %vm34_vm0, %v437_v5  ;;  %v126_v7 = vld [vmem:[%s517_s3] sm:$0xff]  ;;  %v128_v9 = vld [vmem:[%s517_s3 + $0x10] sm:$0xff]  ;;  %v129_v11 = vld [vmem:[%s517_s3 + $0x18] sm:$0xff] }
   0x4   :  { %319 = vmatprep.subr.bf16.mxu0 %v318_v3  ;;  %v326_v10 = vpack.c.bf16 %v127_v8, %v126_v7  ;;  %v330_v12 = vpack.c.bf16 %v129_v11, %v128_v9  ;;  %v130_v13 = vld [vmem:[%s517_s3 + $0x20] sm:$0xff]  ;;  %v131_v14 = vld [vmem:[%s517_s3 + $0x28] sm:$0xff] }
   0x5   :  { %321 = vmatpush3.bf16.msra.mxu0 %v318_v3 }
   0x6   :  { %10 = vsyncpa [#allocation3], 0  ;;  %323 = vmatprep.subr.bf16.mxu0 %v322_v6  ;;  %327 = vmatprep.subr.bf16.mxu1 %v326_v10  ;;  %v334_v15 = vpack.c.bf16 %v131_v14, %v130_v13  ;;  %v22_v16 = vld [vmem:[%s514_s0 + $0x8] sm:$0xff]  ;;  %v132_v17 = vld [vmem:[%s517_s3 + $0x30] sm:$0xff]  ;;  %s389_s11 = smov [#allocation2]  }
   0x7   :  { %329 = vmatpush3.bf16.msra.mxu1 %v326_v10  ;;  %v133_v18 = vld [vmem:[%s517_s3 + $0x38] sm:$0xff]  ;;  %v134_v20 = vld [vmem:[%s517_s3 + $0x40] sm:$0xff]  ;;  %v135_v21 = vld [vmem:[%s517_s3 + $0x48] sm:$0xff]  ;;  %s233_s12 = sshll.u32 %s389_s11, 4  ;;  %s234_s12 = int_to_ptr.vmem [resolvable:$true] %s233_s12 }
   0x8   :  { %331 = vmatprep.subr.bf16.mxu1 %v330_v12  ;;  %v338_v19 = vpack.c.bf16 %v133_v18, %v132_v17  ;;  %v342_v22 = vpack.c.bf16 %v135_v21, %v134_v20  ;;  %v136_v23 = vld [vmem:[%s517_s3 + $0x50] sm:$0xff]  ;;  %v137_v24 = vld [vmem:[%s517_s3 + $0x58] sm:$0xff]  ;;  %v138_v26 = vld [vmem:[%s517_s3 + $0x60] sm:$0xff]  ;;  %s365_s13 = scalar_lea.vmem %s234_s12, 256  ;;  %p370_p1 = scmp.lt.s32.totalorder %s234_s12, %s234_s12 }
   0x9   :  { %325 = vmatpush3.bf16.msra.mxu0 %v322_v6  ;;  %v346_v25 = vpack.c.bf16 %v137_v24, %v136_v23  ;;  %v139_v27 = vld [vmem:[%s517_s3 + $0x68] sm:$0xff]  ;;  %v140_v29 = vld [vmem:[%s517_s3 + $0x70] sm:$0xff]  ;;  %v141_v30 = vld [vmem:[%s517_s3 + $0x78] sm:$0xff]  ;;  %p366_p0 = scmp.ne.s32.totalorder %s234_s12, %s365_s13  ;;  %p371_p2 = scmp.lt.s32.totalorder %s365_s13, %s365_s13 }
   0xa   :  { %v350_v28 = vpack.c.bf16 %v139_v27, %v138_v26  ;;  %v354_v31 = vpack.c.bf16 %v141_v30, %v140_v29  ;;  %v244_v32 = vld [vmem:[%s516_s2] ss:$0 sm:$0xff] }
   0xb   :  { %333 = vmatpush3.bf16.msra.mxu1 %v330_v12  ;;  %v247_v47 = vld [vmem:[%s518_s4] ss:$0 sm:$0xff]  ;;  %p372_p3 = por %p371_p2, %p370_p1 }
   0xc   :  { %281 = vmatmul.mubr.msk.f32.vlgmr.msra.gmra.mrb[0].mxu0 %vm34_vm0, %v22_v16  ;;  %335 = vmatprep.subr.bf16.mxu1 %v334_v15 }
   0xd   :  { %p373_p4 = pnand %p372_p3, %p366_p0 }
   0xf   :  { %337 = vmatpush3.bf16.msra.mxu1 %v334_v15 }
  0x10   :  { %339 = vmatprep.subr.bf16.mxu1 %v338_v19 }
  0x13   :  { %341 = vmatpush3.bf16.msra.mxu1 %v338_v19 }
  0x14   :  { %343 = vmatprep.subr.bf16.mxu1 %v342_v22 }
  0x17   :  { %345 = vmatpush3.bf16.msra.mxu1 %v342_v22 }
  0x18   :  { %347 = vmatprep.subr.bf16.mxu1 %v346_v25 }
  0x1b   :  { %349 = vmatpush3.bf16.msra.mxu1 %v346_v25 }
  0x1c   :  { %351 = vmatprep.subr.bf16.mxu1 %v350_v28 }
  0x1f   :  { %353 = vmatpush3.bf16.msra.mxu1 %v350_v28 }
  0x20   :  { %355 = vmatprep.subr.bf16.mxu1 %v354_v31 }
  0x23   :  { %357 = vmatpush3.bf16.msra.mxu1 %v354_v31 }
  0xdf   :  { %v282_v33 = vpop.f32.mrb[0].mxu0 }
  0xe0   :  { %v113_v34 = vadd.f32 %v282_v33, %v244_v32  ;;  %v107_v35 = vpop.f32.mrb[1].mxu0 }
  0xe1   :  { %v108_v36 = vadd.f32 %v244_v32, %v107_v35 }
  0xe2   :  { %v119_v37 = vmul.f32 0.70710677, %v113_v34  ;;  %v117_v44 = vmul.f32 0.5, %v113_v34 }
  0xe3   :  { %v118_v38 = vmul.f32 0.70710677, %v108_v36  ;;  %v116_v42 = vmul.f32 0.5, %v108_v36 }
  0xe4   :  { %361 = verf.f32 %v119_v37 }
  0xe5   :  { %363 = verf.f32 %v118_v38 }
  0xee   :  { %v362_v39 = vpop.eup %361 }
  0xef   :  { %v364_v40 = vpop.eup %363  ;;  %v123_v41 = vadd.f32 1.0, %v362_v39 }
  0xf0   :  { %v122_v43 = vadd.f32 1.0, %v364_v40 }
  0xf1   :  { %v125_v46 = vmul.f32 %v123_v41, %v117_v44 }
  0xf2   :  { %v124_v45 = vmul.f32 %v122_v43, %v116_v42 }
  0xf4   :  { %315 = vmatprep.mubr.f32.mxu1 %v124_v45 }
  0xf5   :  { %316 = vmatmul.mubr.f32.vlgmr.msra.gmra.mrb[0].mxu1 %v125_v46 }
 0x1c8   :  { %v317_v48 = vpop.f32.mrb[0].mxu1 }
 0x1c9   :  { %v221_v49 = vadd.f32 %v317_v48, %v247_v47  ;;  %v215_v50 = vpop.f32.mrb[1].mxu1 }
 0x1ca   :  { %v216_v51 = vadd.f32 %v247_v47, %v215_v50 }
 0x1cb   :  { %v225_v52 = vadd.f32 %v221_v49, %v22_v16 }
 0x1cc   :  { %v224_v53 = vadd.f32 %v216_v51, %v437_v5 }
 0x1cd   :  { %227 = vst.msk [vmem:[#allocation2 + $0x8] sm:$0xff] %vm34_vm0, %v225_v52 }
 0x1ce   :  { %226 = vst.msk [vmem:[#allocation2] sm:$0xff] %vm34_vm0, %v224_v53 }
 0x1cf   :  { %376 = shalt.err (!%p373_p4)
}
 0x1d0   :  { %s377_s15 = scalar_lea.hbm %s519_s5, 256 }
 0x1d1   :  { %p378_p5 = scmp.ne.s32.totalorder %s519_s5, %s377_s15  ;;  %p381_p6 = scmp.lt.u32.totalorder %s377_s15, %s519_s5 }
 0x1d3   :  { %p383_p7 = pnand %p381_p6, %p378_p5 }
 0x1d5   :  { %386 = shalt.err (!%p383_p7)
}
 0x1d6   :  { %s390_s20 = smov 128   ;;  %s391_s21 = smov 8  }
 0x1d7   :  { %239 = dma.vmem_to_hbm [thread:$0]  %s234_s12, 256, %s519_s5, [#allocation3], %s390_s20, %s390_s20, %s391_s21  }
 0x1d8   :  { %387 = dma.done.wait [#allocation3], 256  }
 0x1d9   :  { %388 = vsyncadd [#allocation3], 4294967040 }
 0x1da   :  { %243 = vsyncpa [#allocation3], 1 }

</bundles_post_ra>
